<compile_context>
chip_gen: v7x
topology: tpu7x:2x2x1
jax: 0.10.0
libtpu: 0.0.40
codegen_flags: <defaults>
</compile_context>

<pallas_src>
import functools
import math

import jax
import jax.numpy as jnp
from jax.experimental import pallas as pl
from jax.experimental.pallas import tpu as pltpu


def _round_up(x, m):
    return (x + m - 1) // m * m


def pick_compute_dtype():
    """bf16 MXU is a clear win on v6e/v7x; keep f32 on v5e and older (no bf16 VALU)."""
    kind = jax.devices()[0].device_kind.lower()
    if any(tag in kind for tag in ("v2", "v3", "v4", "v5")):
        return jnp.float32
    return jnp.bfloat16


def mgnn_kernel(idx_ref, emb_ref, w_ref, b_ref, ia_ref, segia_ref, out_ref,
                *, layer_hidden, compute_dtype):
    """Whole-graph kernel (single invocation, everything VMEM-resident).

    idx_ref   : (N_pad, 1)  int32    padded fingerprint indices (pads -> zero emb row)
    emb_ref   : (NF_pad, D_pad)      embedding table, compute_dtype
    w_ref     : (L, D_pad, D_pad)    per-layer W^T (in, out layout), compute_dtype
    b_ref     : (L, 1, D_pad)        per-layer bias, float32
    ia_ref    : (N_pad, N_pad)       I + block-diagonal adjacency, compute_dtype
    segia_ref : (M_pad, N_pad)       seg @ (I+A) fold (or seg if L == 0), compute_dtype
    out_ref   : (M_pad, D_pad)       molecular vectors, float32
    """
    cdt = compute_dtype
    n_pad = idx_ref.shape[0]
    nf_pad = emb_ref.shape[0]

    # ---- embedding lookup as one-hot @ table (MXU, no gather) ----
    # TODO(synk): switch to a scalar-prefetched DMA row gather once NF is large;
    # the (N_pad, NF_pad) one-hot is the first thing to blow past v7x's 64 MiB VMEM.
    idx = idx_ref[...]                                              # (N_pad, 1) i32
    iota = jax.lax.broadcasted_iota(jnp.int32, (n_pad, nf_pad), 1)
    one_hot = (iota == idx).astype(cdt)                             # (N_pad, NF_pad)
    vectors = jnp.dot(one_hot, emb_ref[...],
                      preferred_element_type=jnp.float32)           # (N_pad, D_pad) f32

    ia = ia_ref[...]                                                # (N_pad, N_pad)

    # ---- message-passing layers: hs = relu(v @ Wt + b);  v = (I+A) @ hs ----
    # (identity folded into A on the host -> no separate elementwise add)
    for l in range(layer_hidden - 1):
        hs = jnp.maximum(
            jnp.dot(vectors.astype(cdt), w_ref[l],
                    preferred_element_type=jnp.float32) + b_ref[l], 0.0)
        vectors = jnp.dot(ia, hs.astype(cdt), preferred_element_type=jnp.float32)

    if layer_hidden > 0:
        vectors = jnp.maximum(
            jnp.dot(vectors.astype(cdt), w_ref[layer_hidden - 1],
                    preferred_element_type=jnp.float32) + b_ref[layer_hidden - 1], 0.0)

    # ---- per-molecule sum, fused with the last (I+A): out = seg_IA @ hs_last ----
    out_ref[...] = jnp.dot(segia_ref[...], vectors.astype(cdt),
                           preferred_element_type=jnp.float32)


def prepare_params(emb, weights, biases, *, compute_dtype=jnp.float32):
    """One-time padding / transpose / cast of the static parameters
    (hoisted out of the per-call path)."""
    nf, d = emb.shape
    num_layers = weights.shape[0]
    d_pad = _round_up(d, 128)                 # lane-dense hidden dim
    nf_pad = _round_up(nf + 1, 128)           # +1 guarantees a zero row for pad atoms

    emb_p = jnp.zeros((nf_pad, d_pad), jnp.float32).at[:nf, :d].set(emb)
    # store W^T so the kernel computes x @ Wt + b   (PyTorch Linear: x @ W.T + b)
    w_p = jnp.zeros((num_layers, d_pad, d_pad), jnp.float32)
    w_p = w_p.at[:, :d, :d].set(jnp.transpose(weights, (0, 2, 1)))
    b_p = jnp.zeros((num_layers, 1, d_pad), jnp.float32).at[:, 0, :d].set(biases)

    return dict(
        emb=emb_p.astype(compute_dtype),
        w=w_p.astype(compute_dtype),
        b=b_p,                              # bias stays f32 (added to f32 accumulator)
        d=d,
        nf=nf,
        pad_index=nf,                       # guaranteed-zero embedding row
        layer_hidden=int(num_layers),
        compute_dtype=compute_dtype,
    )


def mgnn_forward(indices, adjacency, segments, params):
    """indices: (N,) int; adjacency: (N, N) block-diagonal; segments: (M, N) 0/1;
    params: output of prepare_params.  Returns (M, D) float32 molecular vectors."""
    cdt = params["compute_dtype"]
    layer_hidden = params["layer_hidden"]
    d_pad = params["emb"].shape[1]

    n = indices.shape[0]
    m = segments.shape[0]

    n_pad = _round_up(n, 128)                 # lane dim of (I+A) / seg_IA -> lane dense
    m_pad = _round_up(m, 16)                  # sublane dim; 16 covers f32 and bf16 packing

    # padded atom rows point at the guaranteed-zero embedding row
    idx_p = jnp.full((n_pad, 1), params["pad_index"], jnp.int32)
    idx_p = idx_p.at[:n, 0].set(indices.astype(jnp.int32))

    # identity folded into the block-diagonal adjacency:  v = (I+A) @ hs
    ia_p = jnp.eye(n_pad, dtype=jnp.float32).at[:n, :n].add(adjacency)

    seg_p = jnp.zeros((m_pad, n_pad), jnp.float32).at[:m, :n].set(segments)
    # fuse the final per-molecule sum into the last layer: out = (seg @ (I+A)) @ hs_last
    seg_like = seg_p @ ia_p if layer_hidden > 0 else seg_p

    kernel = functools.partial(mgnn_kernel, layer_hidden=layer_hidden,
                               compute_dtype=cdt)

    # Raise the scoped-VMEM limit only once the whole-graph block actually needs it
    # (v5e default scoped VMEM is 16 MiB; v7x physical VMEM is 64 MiB).
    itemsize = jnp.dtype(cdt).itemsize
    nf_pad = params["emb"].shape[0]
    est = (idx_p.size * 4
           + params["emb"].size * itemsize
           + params["w"].size * itemsize
           + params["b"].size * 4
           + ia_p.size * itemsize
           + seg_like.size * itemsize
           + m_pad * d_pad * 4
           + n_pad * nf_pad * itemsize          # one_hot
           + 3 * n_pad * d_pad * 4)             # vectors / hs intermediates
    compiler_params = None
    if est > (14 << 20):
        compiler_params = pltpu.CompilerParams(
            vmem_limit_bytes=min(2 * est, 64 << 20))

    out = pl.pallas_call(
        kernel,
        out_shape=jax.ShapeDtypeStruct((m_pad, d_pad), jnp.float32),
        # whole-array VMEM blocks; no grid -> single invocation, weights resident.
        in_specs=[pl.BlockSpec(memory_space=pltpu.MemorySpace.VMEM)] * 6,
        out_specs=pl.BlockSpec(memory_space=pltpu.MemorySpace.VMEM),
        compiler_params=compiler_params,
    )(idx_p, params["emb"], params["w"], params["b"],
      ia_p.astype(cdt), seg_like.astype(cdt))

    return out[:m, :params["d"]]


def reference_forward(indices, adjacency, mol_sizes, emb, weights, biases):
    """Pure-JAX float32 reference mirroring the PyTorch forward."""
    v = emb[indices]
    for W, b in zip(weights, biases):
        hs = jnp.maximum(v @ W.T + b, 0.0)
        v = hs + adjacency @ hs
    outs = []
    start = 0
    for s in mol_sizes:
        outs.append(v[start:start + s].sum(axis=0))
        start += s
    return jnp.stack(outs)


if __name__ == "__main__":
    key = jax.random.PRNGKey(0)
    N_fingerprint, dim, layer_hidden = 20, 32, 3
    mol_sizes = [5, 7, 4]            # 3 molecules, 16 atoms total
    N = sum(mol_sizes)
    M = len(mol_sizes)

    k_fp, k_adj, k_emb, k_w, k_b = jax.random.split(key, 5)

    # --- build the ragged per-molecule inputs of the PyTorch module ---
    fp_list, adj_list = [], []
    kfs = jax.random.split(k_fp, M)
    kas = jax.random.split(k_adj, M)
    for i, s in enumerate(mol_sizes):
        fp_list.append(jax.random.randint(kfs[i], (s,), 0, N_fingerprint, jnp.int32))
        a = (jax.random.uniform(kas[i], (s, s)) < 0.4).astype(jnp.float32)
        a = jnp.triu(a, 1)
        adj_list.append(a + a.T)     # symmetric 0/1 adjacency, no self-loops

    # torch.cat(fingerprints)
    indices = jnp.concatenate(fp_list)
    # self.pad(adjacencies, 0) -> block-diagonal matrix
    adjacency = jnp.zeros((N, N), jnp.float32)
    off = 0
    for a in adj_list:
        s = a.shape[0]
        adjacency = adjacency.at[off:off + s, off:off + s].set(a)
        off += s
    # molecule-membership indicator (replaces torch.split + per-chunk sum)
    segments = jnp.zeros((M, N), jnp.float32)
    off = 0
    for i, s in enumerate(mol_sizes):
        segments = segments.at[i, off:off + s].set(1.0)
        off += s

    # --- parameters (nn.Embedding ~ N(0,1); nn.Linear default uniform init) ---
    emb = jax.random.normal(k_emb, (N_fingerprint, dim), jnp.float32)
    bound = 1.0 / math.sqrt(dim)
    weights = jax.random.uniform(k_w, (layer_hidden, dim, dim), jnp.float32, -bound, bound)
    biases = jax.random.uniform(k_b, (layer_hidden, dim), jnp.float32, -bound, bound)

    ref = reference_forward(indices, adjacency, mol_sizes, emb, weights, biases)

    # --- f32 kernel vs pure-JAX reference (tight tolerance) ---
    params_f32 = prepare_params(emb, weights, biases, compute_dtype=jnp.float32)
    out = jax.block_until_ready(mgnn_forward(indices, adjacency, segments, params_f32))
    assert out.shape == (M, dim)
    assert jnp.allclose(out, ref, rtol=1e-4, atol=1e-4), "f32 kernel mismatch vs reference"

    # --- bf16 MXU path (v6e/v7x): f32 accumulation, loose tolerance ---
    params_bf16 = prepare_params(emb, weights, biases, compute_dtype=jnp.bfloat16)
    out_bf16 = jax.block_until_ready(mgnn_forward(indices, adjacency, segments, params_bf16))
    rel = float(jnp.max(jnp.abs(out_bf16 - ref)) / (jnp.max(jnp.abs(ref)) + 1e-6))
    assert rel < 0.1, "bf16 kernel deviates too much from f32 reference"

    # (on a real deployment: prepare_params(..., compute_dtype=pick_compute_dtype()))
    print("KERNEL_OK")
</pallas_src>

<mosaic_0001>
module attributes {stable_mosaic.version = 11 : i64} {
  func.func @mgnn_kernel(%arg0: memref<128x1xi32, #tpu.memory_space<vmem>>, %arg1: memref<128x128xf32, #tpu.memory_space<vmem>>, %arg2: memref<3x128x128xf32, #tpu.memory_space<vmem>>, %arg3: memref<3x1x128xf32, #tpu.memory_space<vmem>>, %arg4: memref<128x128xf32, #tpu.memory_space<vmem>>, %arg5: memref<16x128xf32, #tpu.memory_space<vmem>>, %arg6: memref<16x128xf32, #tpu.memory_space<vmem>>) attributes {dimension_semantics = [], scalar_prefetch = 0 : i64, scratch_operands = 0 : i64, tpu.core_type = #tpu.core_type<tc>} {
    %c0 = arith.constant 0 : index
    %c0_0 = arith.constant 0 : index
    %0 = vector.load %arg0[%c0, %c0_0] : memref<128x1xi32, #tpu.memory_space<vmem>>, vector<128x1xi32>
    %1 = tpu.iota {dimensions = array<i32: 1>} : vector<128x128xi32>
    %2 = vector.broadcast %0 : vector<128x1xi32> to vector<128x128xi32>
    %3 = arith.cmpi eq, %1, %2 : vector<128x128xi32>
    %4 = arith.extui %3 : vector<128x128xi1> to vector<128x128xi32>
    %5 = arith.sitofp %4 : vector<128x128xi32> to vector<128x128xf32>
    %c0_1 = arith.constant 0 : index
    %c0_2 = arith.constant 0 : index
    %6 = vector.load %arg1[%c0_1, %c0_2] : memref<128x128xf32, #tpu.memory_space<vmem>>, vector<128x128xf32>
    %cst = arith.constant dense<0.000000e+00> : vector<128x128xf32>
    %7 = tpu.matmul %5, %6, %cst {dimension_numbers = #tpu.dot_dimension_numbers<[1], [0], [0], [1], [0, 0, 1, 1], [], []>} : vector<128x128xf32>, vector<128x128xf32>, vector<128x128xf32> -> vector<128x128xf32>
    %c0_3 = arith.constant 0 : index
    %c0_4 = arith.constant 0 : index
    %8 = vector.load %arg4[%c0_3, %c0_4] : memref<128x128xf32, #tpu.memory_space<vmem>>, vector<128x128xf32>
    %c0_5 = arith.constant 0 : index
    %c0_6 = arith.constant 0 : index
    %c0_7 = arith.constant 0 : index
    %9 = vector.load %arg2[%c0_5, %c0_6, %c0_7] : memref<3x128x128xf32, #tpu.memory_space<vmem>>, vector<1x128x128xf32>
    %10 = vector.shape_cast %9 : vector<1x128x128xf32> to vector<128x128xf32>
    %cst_8 = arith.constant dense<0.000000e+00> : vector<128x128xf32>
    %11 = tpu.matmul %7, %10, %cst_8 {dimension_numbers = #tpu.dot_dimension_numbers<[1], [0], [0], [1], [0, 0, 1, 1], [], []>} : vector<128x128xf32>, vector<128x128xf32>, vector<128x128xf32> -> vector<128x128xf32>
    %c0_9 = arith.constant 0 : index
    %c0_10 = arith.constant 0 : index
    %c0_11 = arith.constant 0 : index
    %12 = vector.load %arg3[%c0_9, %c0_10, %c0_11] : memref<3x1x128xf32, #tpu.memory_space<vmem>>, vector<1x1x128xf32>
    %13 = vector.shape_cast %12 : vector<1x1x128xf32> to vector<1x128xf32>
    %14 = vector.broadcast %13 : vector<1x128xf32> to vector<128x128xf32>
    %15 = arith.addf %11, %14 : vector<128x128xf32>
    %cst_12 = arith.constant 0.000000e+00 : f32
    %16 = vector.broadcast %cst_12 : f32 to vector<128x128xf32>
    %17 = arith.maximumf %15, %16 : vector<128x128xf32>
    %cst_13 = arith.constant dense<0.000000e+00> : vector<128x128xf32>
    %18 = tpu.matmul %8, %17, %cst_13 {dimension_numbers = #tpu.dot_dimension_numbers<[1], [0], [0], [1], [0, 0, 1, 1], [], []>} : vector<128x128xf32>, vector<128x128xf32>, vector<128x128xf32> -> vector<128x128xf32>
    %c1 = arith.constant 1 : index
    %c0_14 = arith.constant 0 : index
    %c0_15 = arith.constant 0 : index
    %19 = vector.load %arg2[%c1, %c0_14, %c0_15] : memref<3x128x128xf32, #tpu.memory_space<vmem>>, vector<1x128x128xf32>
    %20 = vector.shape_cast %19 : vector<1x128x128xf32> to vector<128x128xf32>
    %cst_16 = arith.constant dense<0.000000e+00> : vector<128x128xf32>
    %21 = tpu.matmul %18, %20, %cst_16 {dimension_numbers = #tpu.dot_dimension_numbers<[1], [0], [0], [1], [0, 0, 1, 1], [], []>} : vector<128x128xf32>, vector<128x128xf32>, vector<128x128xf32> -> vector<128x128xf32>
    %c1_17 = arith.constant 1 : index
    %c0_18 = arith.constant 0 : index
    %c0_19 = arith.constant 0 : index
    %22 = vector.load %arg3[%c1_17, %c0_18, %c0_19] : memref<3x1x128xf32, #tpu.memory_space<vmem>>, vector<1x1x128xf32>
    %23 = vector.shape_cast %22 : vector<1x1x128xf32> to vector<1x128xf32>
    %24 = vector.broadcast %23 : vector<1x128xf32> to vector<128x128xf32>
    %25 = arith.addf %21, %24 : vector<128x128xf32>
    %cst_20 = arith.constant 0.000000e+00 : f32
    %26 = vector.broadcast %cst_20 : f32 to vector<128x128xf32>
    %27 = arith.maximumf %25, %26 : vector<128x128xf32>
    %cst_21 = arith.constant dense<0.000000e+00> : vector<128x128xf32>
    %28 = tpu.matmul %8, %27, %cst_21 {dimension_numbers = #tpu.dot_dimension_numbers<[1], [0], [0], [1], [0, 0, 1, 1], [], []>} : vector<128x128xf32>, vector<128x128xf32>, vector<128x128xf32> -> vector<128x128xf32>
    %c2 = arith.constant 2 : index
    %c0_22 = arith.constant 0 : index
    %c0_23 = arith.constant 0 : index
    %29 = vector.load %arg2[%c2, %c0_22, %c0_23] : memref<3x128x128xf32, #tpu.memory_space<vmem>>, vector<1x128x128xf32>
    %30 = vector.shape_cast %29 : vector<1x128x128xf32> to vector<128x128xf32>
    %cst_24 = arith.constant dense<0.000000e+00> : vector<128x128xf32>
    %31 = tpu.matmul %28, %30, %cst_24 {dimension_numbers = #tpu.dot_dimension_numbers<[1], [0], [0], [1], [0, 0, 1, 1], [], []>} : vector<128x128xf32>, vector<128x128xf32>, vector<128x128xf32> -> vector<128x128xf32>
    %c2_25 = arith.constant 2 : index
    %c0_26 = arith.constant 0 : index
    %c0_27 = arith.constant 0 : index
    %32 = vector.load %arg3[%c2_25, %c0_26, %c0_27] : memref<3x1x128xf32, #tpu.memory_space<vmem>>, vector<1x1x128xf32>
    %33 = vector.shape_cast %32 : vector<1x1x128xf32> to vector<1x128xf32>
    %34 = vector.broadcast %33 : vector<1x128xf32> to vector<128x128xf32>
    %35 = arith.addf %31, %34 : vector<128x128xf32>
    %cst_28 = arith.constant 0.000000e+00 : f32
    %36 = vector.broadcast %cst_28 : f32 to vector<128x128xf32>
    %37 = arith.maximumf %35, %36 : vector<128x128xf32>
    %c0_29 = arith.constant 0 : index
    %c0_30 = arith.constant 0 : index
    %38 = vector.load %arg5[%c0_29, %c0_30] : memref<16x128xf32, #tpu.memory_space<vmem>>, vector<16x128xf32>
    %cst_31 = arith.constant dense<0.000000e+00> : vector<16x128xf32>
    %39 = tpu.matmul %38, %37, %cst_31 {dimension_numbers = #tpu.dot_dimension_numbers<[1], [0], [0], [1], [0, 0, 1, 1], [], []>} : vector<16x128xf32>, vector<128x128xf32>, vector<16x128xf32> -> vector<16x128xf32>
    %c0_32 = arith.constant 0 : index
    %c0_33 = arith.constant 0 : index
    %40 = vector.load %arg6[%c0_32, %c0_33] : memref<16x128xf32, #tpu.memory_space<vmem>>, vector<16x128xf32>
    tpu.vector_store %arg6[%c0_32, %c0_33], %39 {strides = array<i32>} : memref<16x128xf32, #tpu.memory_space<vmem>>, vector<16x128xf32>,
    return
  }
}

</mosaic_0001>

<bundles_post_ra>
// kernel: tpu_custom_call.1
= control target key start
LH: loop header
LB: loop body
LE: loop exit
PB: predicated region body
PF: predicated region fallthrough
CT: control target
= control target key end

     0   :  { %11 = vsyncpa [#allocation3], 0  ;;  %s2567_s0 = inlined_call_operand.vmem [shape: s32[128,1], index: 0, kind: input, shape index: {}]   ;;  %s2568_s1 = inlined_call_operand.vmem [shape: f32[128,128], index: 1, kind: input, shape index: {}]   ;;  %s2569_s2 = inlined_call_operand.hbm [shape: f32[3,128,128], index: 2, kind: input, shape index: {}]   ;;  %s2570_s3 = inlined_call_operand.hbm [shape: f32[3,1,128], index: 3, kind: input, shape index: {}]   ;;  %s2571_s4 = inlined_call_operand.hbm [shape: f32[128,128], index: 4, kind: input, shape index: {}]   ;;  %s2572_s5 = inlined_call_operand.vmem [shape: f32[16,128], index: 5, kind: input, shape index: {}]   ;;  %s2573_s6 = inlined_call_operand.hbm [shape: f32[16,128], index: 6, kind: output, shape index: {}]  }
   0x1   :  { %12 = vsyncpa [#allocation6], 0 }
   0x2   :  { %13 = vsyncpa [#allocation4], 0  ;;  %s2245_s21 = smov [#allocation5]   ;;  %s2151_s25 = scalar_lea.hbm %s2570_s3, 48 }
   0x3   :  { %s35_s22 = sshll.u32 %s2245_s21, 4  ;;  %p2152_p0 = scmp.ne.s32.totalorder %s2570_s3, %s2151_s25  ;;  %s36_s22 = int_to_ptr.vmem [resolvable:$true] %s35_s22 }
   0x4   :  { %p2155_p1 = scmp.lt.u32.totalorder %s2151_s25, %s2570_s3 }
   0x6   :  { %p2157_p2 = pnand %p2155_p1, %p2152_p0 }
   0x8   :  { %2160 = shalt.err (!%p2157_p2)
}
   0x9   :  { %s2161_s30 = scalar_lea.vmem %s36_s22, 48  ;;  %s2165_s7 = scalar_lea.vmem %s36_s22, 64 }
   0xa   :  { %p2162_p3 = scmp.ne.s32.totalorder %s36_s22, %s2161_s30  ;;  %p2166_p4 = scmp.lt.s32.totalorder %s36_s22, %s36_s22 }
   0xb   :  { %p2167_p5 = scmp.lt.s32.totalorder %s2165_s7, %s2161_s30 }
   0xd   :  { %p2168_p6 = por %p2167_p5, %p2166_p4 }
   0xf   :  { %p2169_p7 = pnand %p2168_p6, %p2162_p3 }
  0x11   :  { %2172 = shalt.err (!%p2169_p7)
}
  0x12   :  { %s2246_s8 = smov 16   ;;  %s2247_s9 = smov 1  }
  0x13   :  { %41 = dma.hbm_to_vmem [thread:$0]  %s2570_s3, 48, %s36_s22, [#allocation6], %s2246_s8, %s2246_s8, %s2247_s9  }
  0x14   :  { %s2248_s12 = smov [#allocation2]   ;;  %s2173_s16 = scalar_lea.hbm %s2569_s2, 6144 }
  0x15   :  { %s23_s13 = sshll.u32 %s2248_s12, 4  ;;  %p2174_p8 = scmp.ne.s32.totalorder %s2569_s2, %s2173_s16  ;;  %s24_s13 = int_to_ptr.vmem [resolvable:$true] %s23_s13 }
  0x16   :  { %p2177_p9 = scmp.lt.u32.totalorder %s2173_s16, %s2569_s2 }
  0x18   :  { %p2179_p10 = pnand %p2177_p9, %p2174_p8 }
  0x1a   :  { %2182 = shalt.err (!%p2179_p10)
}
  0x1b   :  { %s2183_s21 = scalar_lea.vmem %s24_s13, 6144  ;;  %p2188_p12 = scmp.lt.s32.totalorder %s24_s13, %s24_s13 }
  0x1c   :  { %p2184_p11 = scmp.ne.s32.totalorder %s24_s13, %s2183_s21  ;;  %p2189_p13 = scmp.lt.s32.totalorder %s2183_s21, %s2183_s21 }
  0x1e   :  { %p2190_p0 = por %p2189_p13, %p2188_p12 }
  0x20   :  { %p2191_p1 = pnand %p2190_p0, %p2184_p11 }
  0x22   :  { %2194 = shalt.err (!%p2191_p1)
}
  0x23   :  { %s2249_s3 = smov 128   ;;  %s2250_s22 = smov 8  }
  0x24   :  { %29 = dma.hbm_to_vmem [thread:$0]  %s2569_s2, 6144, %s24_s13, [#allocation3], %s2249_s3, %s2249_s3, %s2250_s22  }
  0x25   :  { %s2251_s25 = smov [#allocation7]   ;;  %s2195_s29 = scalar_lea.hbm %s2571_s4, 2048 }
  0x26   :  { %s47_s26 = sshll.u32 %s2251_s25, 4  ;;  %p2196_p2 = scmp.ne.s32.totalorder %s2571_s4, %s2195_s29  ;;  %s48_s26 = int_to_ptr.vmem [resolvable:$true] %s47_s26 }
  0x27   :  { %p2199_p3 = scmp.lt.u32.totalorder %s2195_s29, %s2571_s4 }
  0x29   :  { %p2201_p4 = pnand %p2199_p3, %p2196_p2 }
  0x2b   :  { %2204 = shalt.err (!%p2201_p4)
}
  0x2c   :  { %s2205_s10 = scalar_lea.vmem %s48_s26, 2048  ;;  %p2210_p6 = scmp.lt.s32.totalorder %s48_s26, %s48_s26 }
  0x2d   :  { %p2206_p5 = scmp.ne.s32.totalorder %s48_s26, %s2205_s10  ;;  %p2211_p7 = scmp.lt.s32.totalorder %s2205_s10, %s2205_s10 }
  0x2f   :  { %p2212_p8 = por %p2211_p7, %p2210_p6 }
  0x31   :  { %p2213_p9 = pnand %p2212_p8, %p2206_p5 }
  0x33   :  { %2216 = shalt.err (!%p2213_p9)
}
  0x34   :  { %53 = dma.hbm_to_vmem [thread:$0]  %s2571_s4, 2048, %s48_s26, [#allocation6], %s2249_s3, %s2249_s3, %s2250_s22  }
  0x35   :  { %2239 = dma.done.wait [#allocation3], 6144  }
  0x36   :  { %2240 = vsyncadd [#allocation3], 4294961152 }
  0x37   :  { %2241 = dma.done.wait [#allocation6], 2096  }
  0x38   :  { %2242 = vsyncadd [#allocation6], 4294965200  ;;  %v2252_v0 = vmov 0   ;;  %v67_v1 = vld [vmem:[%s2567_s0 + $0x10] sm:$0xff]  ;;  %v65_v2 = vld [vmem:[%s2567_s0] sm:$0xff]  ;;  %s2254_s28 = smov [#allocation8]  }
  0x39   :  { %2150 = vset.pattern.permute.xlu1 %v2252_v0  ;;  %2149 = vset.pattern.permute.xlu0 %v2252_v0  ;;  %v68_v3 = vld [vmem:[%s2567_s0 + $0x18] sm:$0xff]  ;;  %v66_v4 = vld [vmem:[%s2567_s0 + $0x8] sm:$0xff]  ;;  %v179_v6 = vld [vmem:[%s2568_s1] sm:$0xff]  ;;  %s1286_s29 = sshll.u32 %s2254_s28, 4  ;;  %s1287_s29 = int_to_ptr.vmem [resolvable:$true] %s1286_s29 }
  0x3a   :  { %90 = vperm.xlu1 %2150, %v67_v1   ;;  %84 = vperm.xlu0 %2149, %v65_v2   ;;  %v70_v5 = vld [vmem:[%s2567_s0 + $0x28] sm:$0xff]  ;;  %v69_v8 = vld [vmem:[%s2567_s0 + $0x20] sm:$0xff]  ;;  %v181_v10 = vld [vmem:[%s2568_s1 + $0x10] sm:$0xff]  ;;  %v81_v1 = vlaneseq  ;;  %s2217_s30 = scalar_lea.vmem %s1287_s29, 256  ;;  %p2222_p11 = scmp.lt.s32.totalorder %s1287_s29, %s1287_s29 }
  0x3b   :  { %v180_v7 = vld [vmem:[%s2568_s1 + $0x8] sm:$0xff]  ;;  %v182_v11 = vld [vmem:[%s2568_s1 + $0x18] sm:$0xff]  ;;  %v183_v13 = vld [vmem:[%s2568_s1 + $0x20] sm:$0xff]  ;;  %p2218_p10 = scmp.ne.s32.totalorder %s1287_s29, %s2217_s30  ;;  %p2223_p12 = scmp.lt.s32.totalorder %s2217_s30, %s2217_s30 }
  0x3c   :  { %v1915_v9 = vpack.c.bf16 %v180_v7, %v179_v6  ;;  %v1919_v12 = vpack.c.bf16 %v182_v11, %v181_v10  ;;  %v184_v14 = vld [vmem:[%s2568_s1 + $0x28] sm:$0xff]  ;;  %v72_v15 = vld [vmem:[%s2567_s0 + $0x38] sm:$0xff]  ;;  %v71_v16 = vld [vmem:[%s2567_s0 + $0x30] sm:$0xff]  ;;  %v82_v2 = vand.u32 127, %v81_v1 }
  0x3d   :  { %v1923_v17 = vpack.c.bf16 %v184_v14, %v183_v13  ;;  %v185_v18 = vld [vmem:[%s2568_s1 + $0x30] sm:$0xff]  ;;  %v186_v19 = vld [vmem:[%s2568_s1 + $0x38] sm:$0xff]  ;;  %v74_v20 = vld [vmem:[%s2567_s0 + $0x48] sm:$0xff]  ;;  %p2224_p13 = por %p2223_p12, %p2222_p11 }
  0x3e   :  { %93 = vperm.xlu1 %2150, %v68_v3   ;;  %87 = vperm.xlu0 %2149, %v66_v4   ;;  %v73_v21 = vld [vmem:[%s2567_s0 + $0x40] sm:$0xff]  ;;  %v1927_v22 = vpack.c.bf16 %v186_v19, %v185_v18  ;;  %v188_v24 = vld [vmem:[%s2568_s1 + $0x48] sm:$0xff]  ;;  %v76_v25 = vld [vmem:[%s2567_s0 + $0x58] sm:$0xff] }
  0x3f   :  { %1916 = vmatprep.subr.bf16.mxu0 %v1915_v9  ;;  %v187_v23 = vld [vmem:[%s2568_s1 + $0x40] sm:$0xff]  ;;  %v75_v26 = vld [vmem:[%s2567_s0 + $0x50] sm:$0xff]  ;;  %v190_v29 = vld [vmem:[%s2568_s1 + $0x58] sm:$0xff]  ;;  %p2225_p0 = pnand %p2224_p13, %p2218_p10 }
  0x40   :  { %1918 = vmatpush3.bf16.msra.mxu0 %v1915_v9  ;;  %v1931_v27 = vpack.c.bf16 %v188_v24, %v187_v23  ;;  %v189_v28 = vld [vmem:[%s2568_s1 + $0x50] sm:$0xff]  ;;  %v78_v30 = vld [vmem:[%s2567_s0 + $0x68] sm:$0xff]  ;;  %v77_v31 = vld [vmem:[%s2567_s0 + $0x60] sm:$0xff] }
  0x41   :  { %1920 = vmatprep.subr.bf16.mxu0 %v1919_v12  ;;  %v1935_v32 = vpack.c.bf16 %v190_v29, %v189_v28  ;;  %v191_v33 = vld [vmem:[%s2568_s1 + $0x60] sm:$0xff]  ;;  %v192_v34 = vld [vmem:[%s2568_s1 + $0x68] sm:$0xff]  ;;  %v80_v35 = vld [vmem:[%s2567_s0 + $0x78] sm:$0xff] }
  0x42   :  { %99 = vperm.xlu1 %2150, %v70_v5   ;;  %96 = vperm.xlu0 %2149, %v69_v8   ;;  %v79_v36 = vld [vmem:[%s2567_s0 + $0x70] sm:$0xff]  ;;  %v1939_v37 = vpack.c.bf16 %v192_v34, %v191_v33  ;;  %v194_v39 = vld [vmem:[%s2568_s1 + $0x78] sm:$0xff]  ;;  %v358_v43 = vld [vmem:[#allocation2 + $0x10] sm:$0xff]  ;;  %v2253_v5 = vmov 1.0  }
  0x43   :  { %v193_v38 = vld [vmem:[%s2568_s1 + $0x70] sm:$0xff]  ;;  %v357_v42 = vld [vmem:[#allocation2 + $0x8] sm:$0xff]  ;;  %v359_v45 = vld [vmem:[#allocation2 + $0x18] sm:$0xff] }
  0x44   :  { %1922 = vmatpush3.bf16.msra.mxu0 %v1919_v12  ;;  %v1943_v40 = vpack.c.bf16 %v194_v39, %v193_v38  ;;  %v356_v41 = vld [vmem:[#allocation2] sm:$0xff]  ;;  %v1951_v46 = vpack.c.bf16 %v359_v45, %v358_v43  ;;  %v361_v48 = vld [vmem:[#allocation2 + $0x28] sm:$0xff]  ;;  %v362_v50 = vld [vmem:[#allocation2 + $0x30] sm:$0xff] }
  0x45   :  { %1924 = vmatprep.subr.bf16.mxu0 %v1923_v17  ;;  %v1947_v44 = vpack.c.bf16 %v357_v42, %v356_v41  ;;  %v360_v47 = vld [vmem:[#allocation2 + $0x20] sm:$0xff]  ;;  %v363_v51 = vld [vmem:[#allocation2 + $0x38] sm:$0xff]  ;;  %v365_v54 = vld [vmem:[#allocation2 + $0x48] sm:$0xff] }
  0x46   :  { %105 = vperm.xlu1 %2150, %v72_v15   ;;  %102 = vperm.xlu0 %2149, %v71_v16   ;;  %v1955_v49 = vpack.c.bf16 %v361_v48, %v360_v47  ;;  %v1959_v52 = vpack.c.bf16 %v363_v51, %v362_v50  ;;  %v364_v53 = vld [vmem:[#allocation2 + $0x40] sm:$0xff]  ;;  %v366_v56 = vld [vmem:[#allocation2 + $0x50] sm:$0xff]  ;;  %v367_v57 = vld [vmem:[#allocation2 + $0x58] sm:$0xff] }
  0x47   :  { %1948 = vmatprep.subr.bf16.mxu1 %v1947_v44  ;;  %v1963_v55 = vpack.c.bf16 %v365_v54, %v364_v53  ;;  %v1967_v58 = vpack.c.bf16 %v367_v57, %v366_v56  ;;  %v368_v59 = vld [vmem:[#allocation2 + $0x60] sm:$0xff]  ;;  %v369_v60 = vld [vmem:[#allocation2 + $0x68] sm:$0xff]  ;;  %v370_v62 = vld [vmem:[#allocation2 + $0x70] sm:$0xff] }
  0x48   :  { %1926 = vmatpush3.bf16.msra.mxu0 %v1923_v17  ;;  %1950 = vmatpush3.bf16.msra.mxu1 %v1947_v44  ;;  %v1971_v61 = vpack.c.bf16 %v369_v60, %v368_v59  ;;  %v371_v63 = vld [vmem:[#allocation2 + $0x78] sm:$0xff]  ;;  %v687_v38 = vld [vmem:[#allocation2 + $0x88] sm:$0xff]  ;;  %v688_v39 = vld [vmem:[#allocation2 + $0x90] sm:$0xff] }
  0x49   :  { %1928 = vmatprep.subr.bf16.mxu0 %v1927_v22  ;;  %1952 = vmatprep.subr.bf16.mxu1 %v1951_v46  ;;  %v1975_v0 = vpack.c.bf16 %v371_v63, %v370_v62  ;;  %v689_v41 = vld [vmem:[#allocation2 + $0x98] sm:$0xff]  ;;  %v690_v43 = vld [vmem:[#allocation2 + $0xa0] sm:$0xff]  ;;  %v691_v44 = vld [vmem:[#allocation2 + $0xa8] sm:$0xff] }
  0x4a   :  { %111 = vperm.xlu1 %2150, %v74_v20   ;;  %108 = vperm.xlu0 %2149, %v73_v21   ;;  %v2015_v42 = vpack.c.bf16 %v689_v41, %v688_v39  ;;  %v2019_v45 = vpack.c.bf16 %v691_v44, %v690_v43  ;;  %v693_v47 = vld [vmem:[#allocation2 + $0xb8] sm:$0xff]  ;;  %v695_v50 = vld [vmem:[#allocation2 + $0xc8] sm:$0xff] }
  0x4b   :  { %v697_v53 = vld [vmem:[#allocation2 + $0xd8] sm:$0xff]  ;;  %v699_v56 = vld [vmem:[#allocation2 + $0xe8] sm:$0xff] }
  0x4c   :  { %1930 = vmatpush3.bf16.msra.mxu0 %v1927_v22  ;;  %1954 = vmatpush3.bf16.msra.mxu1 %v1951_v46  ;;  %v692_v46 = vld [vmem:[#allocation2 + $0xb0] sm:$0xff]  ;;  %v701_v59 = vld [vmem:[#allocation2 + $0xf8] sm:$0xff] }
  0x4d   :  { %1932 = vmatprep.subr.bf16.mxu0 %v1931_v27  ;;  %1956 = vmatprep.subr.bf16.mxu1 %v1955_v49  ;;  %v2023_v48 = vpack.c.bf16 %v693_v47, %v692_v46 }
  0x4e   :  { %117 = vperm.xlu1 %2150, %v76_v25   ;;  %114 = vperm.xlu0 %2149, %v75_v26  }
  0x50   :  { %1934 = vmatpush3.bf16.msra.mxu0 %v1931_v27  ;;  %1958 = vmatpush3.bf16.msra.mxu1 %v1955_v49  ;;  %v694_v49 = vld [vmem:[#allocation2 + $0xc0] sm:$0xff] }
  0x51   :  { %1936 = vmatprep.subr.bf16.mxu0 %v1935_v32  ;;  %1960 = vmatprep.subr.bf16.mxu1 %v1959_v52  ;;  %v2027_v51 = vpack.c.bf16 %v695_v50, %v694_v49 }
  0x52   :  { %123 = vperm.xlu1 %2150, %v78_v30   ;;  %120 = vperm.xlu0 %2149, %v77_v31  }
  0x54   :  { %1938 = vmatpush3.bf16.msra.mxu0 %v1935_v32  ;;  %1962 = vmatpush3.bf16.msra.mxu1 %v1959_v52  ;;  %v696_v52 = vld [vmem:[#allocation2 + $0xd0] sm:$0xff] }
  0x55   :  { %1940 = vmatprep.subr.bf16.mxu0 %v1939_v37  ;;  %1964 = vmatprep.subr.bf16.mxu1 %v1963_v55  ;;  %v2031_v54 = vpack.c.bf16 %v697_v53, %v696_v52 }
  0x56   :  { %129 = vperm.xlu1 %2150, %v80_v35   ;;  %126 = vperm.xlu0 %2149, %v79_v36   ;;  %v2428_v36 = vld [vmem:[#allocation7] sm:$0xff] }
  0x58   :  { %1942 = vmatpush3.bf16.msra.mxu0 %v1939_v37  ;;  %1966 = vmatpush3.bf16.msra.mxu1 %v1963_v55  ;;  %v686_v37 = vld [vmem:[#allocation2 + $0x80] sm:$0xff] }
  0x59   :  { %1944 = vmatprep.subr.bf16.mxu0 %v1943_v40  ;;  %1968 = vmatprep.subr.bf16.mxu1 %v1967_v58  ;;  %v698_v55 = vld [vmem:[#allocation2 + $0xe0] sm:$0xff] }
  0x5a   :  { %v2035_v57 = vpack.c.bf16 %v699_v56, %v698_v55  ;;  %v2449_v55 = vld [vmem:[#allocation7 + $0x8] sm:$0xff]  ;;  %v2451_v56 = vld [vmem:[#allocation7 + $0x10] sm:$0xff] }
  0x5c   :  { %1946 = vmatpush3.bf16.msra.mxu0 %v1943_v40  ;;  %1970 = vmatpush3.bf16.msra.mxu1 %v1967_v58  ;;  %v2011_v40 = vpack.c.bf16 %v687_v38, %v686_v37  ;;  %v700_v58 = vld [vmem:[#allocation2 + $0xf0] sm:$0xff] }
  0x5d   :  { %1972 = vmatprep.subr.bf16.mxu1 %v1971_v61  ;;  %v2039_v60 = vpack.c.bf16 %v701_v59, %v700_v58  ;;  %v2457_v58 = vld [vmem:[#allocation7 + $0x20] sm:$0xff]  ;;  %v2461_v59 = vld [vmem:[#allocation7 + $0x28] sm:$0xff] }
  0x60   :  { %1974 = vmatpush3.bf16.msra.mxu1 %v1971_v61  ;;  %v2431_v61 = vld [vmem:[#allocation5] ss:$0 sm:$0xff] }
  0x61   :  { %1976 = vmatprep.subr.bf16.mxu1 %v1975_v0 }
  0x64   :  { %1978 = vmatpush3.bf16.msra.mxu1 %v1975_v0 }
  0x65   :  { %2012 = vmatprep.subr.bf16.mxu1 %v2011_v40 }
  0xb9   :  { %v91_v3 = vpop.permute.xlu1 %90  ;;  %v85_v4 = vpop.permute.xlu0 %84 }
  0xba   :  { %vm131_vm0 = vcmp.eq.s32.totalorder %v82_v2, %v85_v4  ;;  %vm133_vm1 = vcmp.eq.s32.totalorder %v82_v2, %v91_v3 }
  0xbb   :  { %1576 = vmatprep.mubr.msk.f32.mxu0 %vm131_vm0, %v2253_v5 }
  0xbd   :  { %v94_v6 = vpop.permute.xlu1 %93  ;;  %v88_v7 = vpop.permute.xlu0 %87 }
  0xbe   :  { %vm132_vm2 = vcmp.eq.s32.totalorder %v82_v2, %v88_v7  ;;  %vm134_vm3 = vcmp.eq.s32.totalorder %v82_v2, %v94_v6 }
  0xbf   :  { %1577 = vmatmul.mubr.msk.f32.vlgmr.msra.gmra.mrb[0].mxu0 %vm132_vm2, %v2253_v5 }
  0xc0   :  { %1579 = vmatprep.mubr.msk.f32.mxu0 %vm133_vm1, %v2253_v5 }
  0xc1   :  { %v100_v8 = vpop.permute.xlu1 %99  ;;  %v97_v9 = vpop.permute.xlu0 %96 }
  0xc2   :  { %vm135_vm4 = vcmp.eq.s32.totalorder %v82_v2, %v97_v9  ;;  %vm136_vm5 = vcmp.eq.s32.totalorder %v82_v2, %v100_v8 }
  0xc3   :  { %1580 = vmatmul.mubr.msk.f32.gmra.mrb[2].mxu0 %vm134_vm3, %v2253_v5 }
  0xc4   :  { %1582 = vmatprep.mubr.msk.f32.mxu0 %vm135_vm4, %v2253_v5 }
  0xc5   :  { %v106_v10 = vpop.permute.xlu1 %105  ;;  %v103_v11 = vpop.permute.xlu0 %102 }
  0xc6   :  { %vm137_vm6 = vcmp.eq.s32.totalorder %v82_v2, %v103_v11  ;;  %vm138_vm7 = vcmp.eq.s32.totalorder %v82_v2, %v106_v10 }
  0xc7   :  { %1583 = vmatmul.mubr.msk.f32.gmra.mrb[4].mxu0 %vm136_vm5, %v2253_v5 }
  0xc8   :  { %1585 = vmatprep.mubr.msk.f32.mxu0 %vm137_vm6, %v2253_v5 }
  0xc9   :  { %v112_v12 = vpop.permute.xlu1 %111  ;;  %v109_v13 = vpop.permute.xlu0 %108 }
  0xca   :  { %vm139_vm8 = vcmp.eq.s32.totalorder %v82_v2, %v109_v13  ;;  %vm140_vm9 = vcmp.eq.s32.totalorder %v82_v2, %v112_v12 }
  0xcb   :  { %1586 = vmatmul.mubr.msk.f32.gmra.mrb[6].mxu0 %vm138_vm7, %v2253_v5 }
  0xcc   :  { %1588 = vmatprep.mubr.msk.f32.mxu0 %vm139_vm8, %v2253_v5 }
  0xcd   :  { %v118_v14 = vpop.permute.xlu1 %117  ;;  %v115_v15 = vpop.permute.xlu0 %114 }
  0xce   :  { %vm141_vm10 = vcmp.eq.s32.totalorder %v82_v2, %v115_v15  ;;  %vm142_vm11 = vcmp.eq.s32.totalorder %v82_v2, %v118_v14 }
  0xcf   :  { %1589 = vmatmul.mubr.msk.f32.gmra.mrb[8].mxu0 %vm140_vm9, %v2253_v5 }
  0xd0   :  { %1591 = vmatprep.mubr.msk.f32.mxu0 %vm141_vm10, %v2253_v5 }
  0xd1   :  { %v124_v16 = vpop.permute.xlu1 %123  ;;  %v121_v17 = vpop.permute.xlu0 %120 }
  0xd2   :  { %vm143_vm12 = vcmp.eq.s32.totalorder %v82_v2, %v121_v17  ;;  %vm144_vm13 = vcmp.eq.s32.totalorder %v82_v2, %v124_v16 }
  0xd3   :  { %1592 = vmatmul.mubr.msk.f32.gmra.mrb[10].mxu0 %vm142_vm11, %v2253_v5 }
  0xd4   :  { %1594 = vmatprep.mubr.msk.f32.mxu0 %vm143_vm12, %v2253_v5 }
  0xd5   :  { %v127_v18 = vpop.permute.xlu0 %126  ;;  %v130_v19 = vpop.permute.xlu1 %129 }
  0xd6   :  { %vm145_vm14 = vcmp.eq.s32.totalorder %v82_v2, %v127_v18  ;;  %vm146_vm15 = vcmp.eq.s32.totalorder %v82_v2, %v130_v19 }
  0xd7   :  { %1595 = vmatmul.mubr.msk.f32.gmra.mrb[12].mxu0 %vm144_vm13, %v2253_v5 }
  0xd8   :  { %1597 = vmatprep.mubr.msk.f32.mxu0 %vm145_vm14, %v2253_v5 }
  0xdb   :  { %1598 = vmatmul.mubr.msk.f32.gmra.mrb[14].mxu0 %vm146_vm15, %v2253_v5 }
  0xdc   :  { %1688 = vmatprep.mubr.f32.mxu0 %v2428_v36 }
 0x192   :  { %v1578_v20 = vpop.f32.mrb[0].mxu0 }
 0x193   :  { %v261_v21 = vpop.f32.mrb[1].mxu0 }
 0x194   :  { %1632 = vmatprep.mubr.f32.mxu1 %v261_v21 }
 0x195   :  { %1633 = vmatmul.mubr.f32.vlgmr.msra.gmra.mrb[0].mxu1 %v1578_v20 }
 0x196   :  { %v1581_v22 = vpop.f32.mrb[2].mxu0  ;;  %2014 = vmatpush3.bf16.msra.mxu1 %v2011_v40 }
 0x197   :  { %v271_v23 = vpop.f32.mrb[3].mxu0  ;;  %2016 = vmatprep.subr.bf16.mxu1 %v2015_v42 }
 0x198   :  { %1635 = vmatprep.mubr.f32.mxu1 %v271_v23 }
 0x199   :  { %1636 = vmatmul.mubr.f32.gmra.mrb[2].mxu1 %v1581_v22 }
 0x19a   :  { %v1584_v24 = vpop.f32.mrb[4].mxu0  ;;  %2018 = vmatpush3.bf16.msra.mxu1 %v2015_v42 }
 0x19b   :  { %v281_v25 = vpop.f32.mrb[5].mxu0  ;;  %2020 = vmatprep.subr.bf16.mxu1 %v2019_v45 }
 0x19c   :  { %1638 = vmatprep.mubr.f32.mxu1 %v281_v25 }
 0x19d   :  { %1639 = vmatmul.mubr.f32.gmra.mrb[4].mxu1 %v1584_v24 }
 0x19e   :  { %v1587_v26 = vpop.f32.mrb[6].mxu0  ;;  %2022 = vmatpush3.bf16.msra.mxu1 %v2019_v45 }
 0x19f   :  { %v291_v27 = vpop.f32.mrb[7].mxu0  ;;  %2024 = vmatprep.subr.bf16.mxu1 %v2023_v48 }
 0x1a0   :  { %1641 = vmatprep.mubr.f32.mxu1 %v291_v27 }
 0x1a1   :  { %1642 = vmatmul.mubr.f32.gmra.mrb[6].mxu1 %v1587_v26 }
 0x1a2   :  { %v1590_v28 = vpop.f32.mrb[8].mxu0  ;;  %2026 = vmatpush3.bf16.msra.mxu1 %v2023_v48 }
 0x1a3   :  { %v301_v29 = vpop.f32.mrb[9].mxu0  ;;  %2028 = vmatprep.subr.bf16.mxu1 %v2027_v51 }
 0x1a4   :  { %1644 = vmatprep.mubr.f32.mxu1 %v301_v29 }
 0x1a5   :  { %1645 = vmatmul.mubr.f32.gmra.mrb[8].mxu1 %v1590_v28 }
 0x1a6   :  { %v1593_v30 = vpop.f32.mrb[10].mxu0  ;;  %2030 = vmatpush3.bf16.msra.mxu1 %v2027_v51 }
 0x1a7   :  { %v311_v31 = vpop.f32.mrb[11].mxu0  ;;  %2032 = vmatprep.subr.bf16.mxu1 %v2031_v54 }
 0x1a8   :  { %1647 = vmatprep.mubr.f32.mxu1 %v311_v31 }
 0x1a9   :  { %1648 = vmatmul.mubr.f32.gmra.mrb[10].mxu1 %v1593_v30 }
 0x1aa   :  { %v1596_v32 = vpop.f32.mrb[12].mxu0  ;;  %2034 = vmatpush3.bf16.msra.mxu1 %v2031_v54 }
 0x1ab   :  { %v321_v33 = vpop.f32.mrb[13].mxu0  ;;  %2036 = vmatprep.subr.bf16.mxu1 %v2035_v57 }
 0x1ac   :  { %1650 = vmatprep.mubr.f32.mxu1 %v321_v33 }
 0x1ad   :  { %1651 = vmatmul.mubr.f32.gmra.mrb[12].mxu1 %v1596_v32 }
 0x1ae   :  { %v1599_v34 = vpop.f32.mrb[14].mxu0  ;;  %2038 = vmatpush3.bf16.msra.mxu1 %v2035_v57  ;;  %v2455_v57 = vld [vmem:[#allocation7 + $0x18] sm:$0xff] }
 0x1af   :  { %v331_v35 = vpop.f32.mrb[15].mxu0  ;;  %2040 = vmatprep.subr.bf16.mxu1 %v2039_v60 }
 0x1b0   :  { %1653 = vmatprep.mubr.f32.mxu1 %v331_v35 }
 0x1b1   :  { %1654 = vmatmul.mubr.f32.gmra.mrb[14].mxu1 %v1599_v34 }
 0x1b2   :  { %2042 = vmatpush3.bf16.msra.mxu1 %v2039_v60  ;;  %v2463_v60 = vld [vmem:[#allocation7 + $0x30] sm:$0xff] }
 0x268   :  { %v1634_v62 = vpop.f32.mrb[0].mxu1 }
 0x269   :  { %v451_v63 = vadd.f32 %v1634_v62, %v2431_v61  ;;  %v445_v0 = vpop.f32.mrb[1].mxu1  ;;  %v2469_v62 = vld [vmem:[#allocation7 + $0x40] sm:$0xff] }
 0x26a   :  { %v446_v1 = vadd.f32 %v2431_v61, %v445_v0  ;;  %v2475_v0 = vld [vmem:[#allocation7 + $0x50] sm:$0xff] }
 0x26b   :  { %v525_v2 = vmax.f32 %v451_v63, 0.0  ;;  %v2473_v63 = vld [vmem:[#allocation7 + $0x48] sm:$0xff] }
 0x26c   :  { %v524_v3 = vmax.f32 %v446_v1, 0.0  ;;  %v1637_v4 = vpop.f32.mrb[2].mxu1  ;;  %v2479_v1 = vld [vmem:[#allocation7 + $0x58] sm:$0xff] }
 0x26d   :  { %v461_v5 = vadd.f32 %v1637_v4, %v2431_v61  ;;  %v455_v6 = vpop.f32.mrb[3].mxu1  ;;  %v2487_v4 = vld [vmem:[#allocation7 + $0x70] sm:$0xff] }
 0x26e   :  { %v1979_v7 = vpack.c.bf16 %v525_v2, %v524_v3  ;;  %v456_v8 = vadd.f32 %v2431_v61, %v455_v6  ;;  %v2481_v2 = vld [vmem:[#allocation7 + $0x60] sm:$0xff]  ;;  %v2485_v3 = vld [vmem:[#allocation7 + $0x68] sm:$0xff] }
 0x26f   :  { %v527_v9 = vmax.f32 %v461_v5, 0.0  ;;  %v2491_v5 = vld [vmem:[#allocation7 + $0x78] sm:$0xff] }
 0x270   :  { %v526_v10 = vmax.f32 %v456_v8, 0.0  ;;  %v1640_v11 = vpop.f32.mrb[4].mxu1  ;;  %1980 = vmatprep.subr.bf16.mxu0 %v1979_v7 }
 0x271   :  { %v471_v12 = vadd.f32 %v1640_v11, %v2431_v61  ;;  %v465_v13 = vpop.f32.mrb[5].mxu1  ;;  %1982 = vmatpush3.bf16.msra.mxu0 %v1979_v7 }
 0x272   :  { %v1983_v14 = vpack.c.bf16 %v527_v9, %v526_v10  ;;  %v466_v15 = vadd.f32 %v2431_v61, %v465_v13 }
 0x273   :  { %v529_v16 = vmax.f32 %v471_v12, 0.0 }
 0x274   :  { %v528_v17 = vmax.f32 %v466_v15, 0.0  ;;  %v1643_v18 = vpop.f32.mrb[6].mxu1  ;;  %1984 = vmatprep.subr.bf16.mxu0 %v1983_v14 }
 0x275   :  { %v481_v19 = vadd.f32 %v1643_v18, %v2431_v61  ;;  %v475_v20 = vpop.f32.mrb[7].mxu1  ;;  %1986 = vmatpush3.bf16.msra.mxu0 %v1983_v14 }
 0x276   :  { %v1987_v21 = vpack.c.bf16 %v529_v16, %v528_v17  ;;  %v476_v22 = vadd.f32 %v2431_v61, %v475_v20 }
 0x277   :  { %v531_v23 = vmax.f32 %v481_v19, 0.0 }
 0x278   :  { %v530_v24 = vmax.f32 %v476_v22, 0.0  ;;  %v1646_v25 = vpop.f32.mrb[8].mxu1  ;;  %1988 = vmatprep.subr.bf16.mxu0 %v1987_v21  ;;  %v1018_v22 = vld [vmem:[#allocation2 + $0x108] sm:$0xff] }
 0x279   :  { %v491_v26 = vadd.f32 %v1646_v25, %v2431_v61  ;;  %v485_v27 = vpop.f32.mrb[9].mxu1  ;;  %1990 = vmatpush3.bf16.msra.mxu0 %v1987_v21  ;;  %v1017_v21 = vld [vmem:[#allocation2 + $0x100] sm:$0xff]  ;;  %v1020_v25 = vld [vmem:[#allocation2 + $0x118] sm:$0xff] }
 0x27a   :  { %v1991_v28 = vpack.c.bf16 %v531_v23, %v530_v24  ;;  %v486_v29 = vadd.f32 %v2431_v61, %v485_v27  ;;  %v1019_v23 = vld [vmem:[#allocation2 + $0x110] sm:$0xff]  ;;  %v2075_v24 = vpack.c.bf16 %v1018_v22, %v1017_v21  ;;  %v1021_v27 = vld [vmem:[#allocation2 + $0x120] sm:$0xff] }
 0x27b   :  { %v533_v30 = vmax.f32 %v491_v26, 0.0  ;;  %v2079_v26 = vpack.c.bf16 %v1020_v25, %v1019_v23 }
 0x27c   :  { %v532_v31 = vmax.f32 %v486_v29, 0.0  ;;  %v1649_v32 = vpop.f32.mrb[10].mxu1  ;;  %1992 = vmatprep.subr.bf16.mxu0 %v1991_v28  ;;  %2076 = vmatprep.subr.bf16.mxu1 %v2075_v24 }
 0x27d   :  { %v501_v33 = vadd.f32 %v1649_v32, %v2431_v61  ;;  %v495_v34 = vpop.f32.mrb[11].mxu1  ;;  %1994 = vmatpush3.bf16.msra.mxu0 %v1991_v28  ;;  %v1022_v28 = vld [vmem:[#allocation2 + $0x128] sm:$0xff] }
 0x27e   :  { %v1995_v35 = vpack.c.bf16 %v533_v30, %v532_v31  ;;  %v496_v37 = vadd.f32 %v2431_v61, %v495_v34  ;;  %v2083_v29 = vpack.c.bf16 %v1022_v28, %v1021_v27  ;;  %v1023_v30 = vld [vmem:[#allocation2 + $0x130] sm:$0xff]  ;;  %v1024_v31 = vld [vmem:[#allocation2 + $0x138] sm:$0xff]  ;;  %v1026_v34 = vld [vmem:[#allocation2 + $0x148] sm:$0xff] }
 0x27f   :  { %v535_v38 = vmax.f32 %v501_v33, 0.0  ;;  %v2087_v32 = vpack.c.bf16 %v1024_v31, %v1023_v30  ;;  %v1025_v33 = vld [vmem:[#allocation2 + $0x140] sm:$0xff] }
 0x280   :  { %v534_v39 = vmax.f32 %v496_v37, 0.0  ;;  %v1652_v40 = vpop.f32.mrb[12].mxu1  ;;  %1996 = vmatprep.subr.bf16.mxu0 %v1995_v35  ;;  %v1027_v37 = vld [vmem:[#allocation2 + $0x150] sm:$0xff] }
 0x281   :  { %v511_v41 = vadd.f32 %v1652_v40, %v2431_v61  ;;  %v505_v42 = vpop.f32.mrb[13].mxu1  ;;  %1998 = vmatpush3.bf16.msra.mxu0 %v1995_v35  ;;  %v2091_v35 = vpack.c.bf16 %v1026_v34, %v1025_v33  ;;  %v1029_v40 = vld [vmem:[#allocation2 + $0x160] sm:$0xff] }
 0x282   :  { %v1999_v43 = vpack.c.bf16 %v535_v38, %v534_v39  ;;  %v506_v44 = vadd.f32 %v2431_v61, %v505_v42  ;;  %v1028_v38 = vld [vmem:[#allocation2 + $0x158] sm:$0xff] }
 0x283   :  { %v537_v45 = vmax.f32 %v511_v41, 0.0  ;;  %v2095_v39 = vpack.c.bf16 %v1028_v38, %v1027_v37  ;;  %v1030_v41 = vld [vmem:[#allocation2 + $0x168] sm:$0xff] }
 0x284   :  { %v536_v46 = vmax.f32 %v506_v44, 0.0  ;;  %v1655_v47 = vpop.f32.mrb[14].mxu1  ;;  %2000 = vmatprep.subr.bf16.mxu0 %v1999_v43  ;;  %v2099_v42 = vpack.c.bf16 %v1030_v41, %v1029_v40  ;;  %v1032_v44 = vld [vmem:[#allocation2 + $0x178] sm:$0xff] }
 0x285   :  { %v521_v48 = vadd.f32 %v1655_v47, %v2431_v61  ;;  %v515_v49 = vpop.f32.mrb[15].mxu1  ;;  %2002 = vmatpush3.bf16.msra.mxu0 %v1999_v43  ;;  %v1031_v43 = vld [vmem:[#allocation2 + $0x170] sm:$0xff] }
 0x286   :  { %v2003_v50 = vpack.c.bf16 %v537_v45, %v536_v46  ;;  %v516_v51 = vadd.f32 %v2431_v61, %v515_v49  ;;  %v2467_v61 = vld [vmem:[#allocation7 + $0x38] sm:$0xff]  ;;  %v2103_v45 = vpack.c.bf16 %v1032_v44, %v1031_v43 }
 0x287   :  { %v539_v52 = vmax.f32 %v521_v48, 0.0  ;;  %v2495_v46 = vld [vmem:[#allocation5 + $0x1] ss:$0 sm:$0xff] }
 0x288   :  { %v538_v53 = vmax.f32 %v516_v51, 0.0  ;;  %2004 = vmatprep.subr.bf16.mxu0 %v2003_v50 }
 0x289   :  { %2006 = vmatpush3.bf16.msra.mxu0 %v2003_v50 }
 0x28a   :  { %v2007_v54 = vpack.c.bf16 %v539_v52, %v538_v53 }
 0x28c   :  { %2008 = vmatprep.subr.bf16.mxu0 %v2007_v54 }
 0x28d   :  { %2010 = vmatpush3.bf16.msra.mxu0 %v2007_v54 }
 0x290   :  { %1689 = vmatmul.mubr.f32.vlgmr.msra.gmra.mrb[16].mxu0 %v2449_v55 }
 0x291   :  { %1691 = vmatprep.mubr.f32.mxu0 %v2451_v56 }
 0x294   :  { %1692 = vmatmul.mubr.f32.gmra.mrb[18].mxu0 %v2455_v57 }
 0x295   :  { %1694 = vmatprep.mubr.f32.mxu0 %v2457_v58 }
 0x298   :  { %1695 = vmatmul.mubr.f32.gmra.mrb[20].mxu0 %v2461_v59 }
 0x299   :  { %1697 = vmatprep.mubr.f32.mxu0 %v2463_v60 }
 0x29c   :  { %1698 = vmatmul.mubr.f32.gmra.mrb[22].mxu0 %v2467_v61 }
 0x29d   :  { %1700 = vmatprep.mubr.f32.mxu0 %v2469_v62 }
 0x2a0   :  { %1701 = vmatmul.mubr.f32.gmra.mrb[24].mxu0 %v2473_v63 }
 0x2a1   :  { %1703 = vmatprep.mubr.f32.mxu0 %v2475_v0 }
 0x2a4   :  { %1704 = vmatmul.mubr.f32.gmra.mrb[26].mxu0 %v2479_v1 }
 0x2a5   :  { %1706 = vmatprep.mubr.f32.mxu0 %v2481_v2 }
 0x2a8   :  { %1707 = vmatmul.mubr.f32.gmra.mrb[28].mxu0 %v2485_v3 }
 0x2a9   :  { %1709 = vmatprep.mubr.f32.mxu0 %v2487_v4 }
 0x2ac   :  { %1710 = vmatmul.mubr.f32.gmra.mrb[30].mxu0 %v2491_v5 }
 0x2ad   :  { %1800 = vmatprep.mubr.f32.mxu0 %v2428_v36 }
 0x363   :  { %v1690_v6 = vpop.f32.mrb[16].mxu0 }
 0x364   :  { %v606_v7 = vpop.f32.mrb[17].mxu0 }
 0x365   :  { %1744 = vmatprep.mubr.f32.mxu1 %v606_v7 }
 0x366   :  { %1745 = vmatmul.mubr.f32.vlgmr.msra.gmra.mrb[16].mxu1 %v1690_v6 }
 0x367   :  { %v1693_v8 = vpop.f32.mrb[18].mxu0  ;;  %2078 = vmatpush3.bf16.msra.mxu1 %v2075_v24 }
 0x368   :  { %v616_v9 = vpop.f32.mrb[19].mxu0  ;;  %2080 = vmatprep.subr.bf16.mxu1 %v2079_v26 }
 0x369   :  { %1747 = vmatprep.mubr.f32.mxu1 %v616_v9 }
 0x36a   :  { %1748 = vmatmul.mubr.f32.gmra.mrb[18].mxu1 %v1693_v8 }
 0x36b   :  { %v1696_v10 = vpop.f32.mrb[20].mxu0  ;;  %2082 = vmatpush3.bf16.msra.mxu1 %v2079_v26 }
 0x36c   :  { %v626_v11 = vpop.f32.mrb[21].mxu0  ;;  %2084 = vmatprep.subr.bf16.mxu1 %v2083_v29 }
 0x36d   :  { %1750 = vmatprep.mubr.f32.mxu1 %v626_v11 }
 0x36e   :  { %1751 = vmatmul.mubr.f32.gmra.mrb[20].mxu1 %v1696_v10 }
 0x36f   :  { %v1699_v12 = vpop.f32.mrb[22].mxu0  ;;  %2086 = vmatpush3.bf16.msra.mxu1 %v2083_v29 }
 0x370   :  { %v636_v13 = vpop.f32.mrb[23].mxu0  ;;  %2088 = vmatprep.subr.bf16.mxu1 %v2087_v32 }
 0x371   :  { %1753 = vmatprep.mubr.f32.mxu1 %v636_v13 }
 0x372   :  { %1754 = vmatmul.mubr.f32.gmra.mrb[22].mxu1 %v1699_v12 }
 0x373   :  { %v1702_v14 = vpop.f32.mrb[24].mxu0  ;;  %2090 = vmatpush3.bf16.msra.mxu1 %v2087_v32 }
 0x374   :  { %v646_v15 = vpop.f32.mrb[25].mxu0  ;;  %2092 = vmatprep.subr.bf16.mxu1 %v2091_v35 }
 0x375   :  { %1756 = vmatprep.mubr.f32.mxu1 %v646_v15 }
 0x376   :  { %1757 = vmatmul.mubr.f32.gmra.mrb[24].mxu1 %v1702_v14 }
 0x377   :  { %v1705_v36 = vpop.f32.mrb[26].mxu0  ;;  %2094 = vmatpush3.bf16.msra.mxu1 %v2091_v35 }
 0x378   :  { %v656_v16 = vpop.f32.mrb[27].mxu0  ;;  %2096 = vmatprep.subr.bf16.mxu1 %v2095_v39 }
 0x379   :  { %1759 = vmatprep.mubr.f32.mxu1 %v656_v16 }
 0x37a   :  { %1760 = vmatmul.mubr.f32.gmra.mrb[26].mxu1 %v1705_v36 }
 0x37b   :  { %v1708_v17 = vpop.f32.mrb[28].mxu0  ;;  %2098 = vmatpush3.bf16.msra.mxu1 %v2095_v39 }
 0x37c   :  { %v666_v18 = vpop.f32.mrb[29].mxu0  ;;  %2100 = vmatprep.subr.bf16.mxu1 %v2099_v42 }
 0x37d   :  { %1762 = vmatprep.mubr.f32.mxu1 %v666_v18 }
 0x37e   :  { %1763 = vmatmul.mubr.f32.gmra.mrb[28].mxu1 %v1708_v17 }
 0x37f   :  { %v1711_v19 = vpop.f32.mrb[30].mxu0  ;;  %2102 = vmatpush3.bf16.msra.mxu1 %v2099_v42 }
 0x380   :  { %v676_v20 = vpop.f32.mrb[31].mxu0  ;;  %2104 = vmatprep.subr.bf16.mxu1 %v2103_v45 }
 0x381   :  { %1765 = vmatprep.mubr.f32.mxu1 %v676_v20 }
 0x382   :  { %1766 = vmatmul.mubr.f32.gmra.mrb[30].mxu1 %v1711_v19 }
 0x383   :  { %2106 = vmatpush3.bf16.msra.mxu1 %v2103_v45 }
 0x439   :  { %v1746_v47 = vpop.f32.mrb[16].mxu1 }
 0x43a   :  { %v782_v48 = vadd.f32 %v1746_v47, %v2495_v46  ;;  %v776_v49 = vpop.f32.mrb[17].mxu1 }
 0x43b   :  { %v777_v50 = vadd.f32 %v2495_v46, %v776_v49 }
 0x43c   :  { %v856_v51 = vmax.f32 %v782_v48, 0.0 }
 0x43d   :  { %v855_v52 = vmax.f32 %v777_v50, 0.0  ;;  %v1749_v53 = vpop.f32.mrb[18].mxu1 }
 0x43e   :  { %v792_v54 = vadd.f32 %v1749_v53, %v2495_v46  ;;  %v786_v6 = vpop.f32.mrb[19].mxu1 }
 0x43f   :  { %v2043_v7 = vpack.c.bf16 %v856_v51, %v855_v52  ;;  %v787_v8 = vadd.f32 %v2495_v46, %v786_v6  ;;  %v1202_v6 = vld [vmem:[%s2572_s5] sm:$0xff] }
 0x440   :  { %v858_v9 = vmax.f32 %v792_v54, 0.0 }
 0x441   :  { %v857_v10 = vmax.f32 %v787_v8, 0.0  ;;  %v1752_v11 = vpop.f32.mrb[20].mxu1  ;;  %2044 = vmatprep.subr.bf16.mxu0 %v2043_v7 }
 0x442   :  { %v802_v12 = vadd.f32 %v1752_v11, %v2495_v46  ;;  %v796_v13 = vpop.f32.mrb[21].mxu1  ;;  %2046 = vmatpush3.bf16.msra.mxu0 %v2043_v7  ;;  %v2531_v7 = vld [vmem:[#allocation5 + $0x2] ss:$0 sm:$0xff] }
 0x443   :  { %v2047_v14 = vpack.c.bf16 %v858_v9, %v857_v10  ;;  %v797_v15 = vadd.f32 %v2495_v46, %v796_v13 }
 0x444   :  { %v860_v36 = vmax.f32 %v802_v12, 0.0 }
 0x445   :  { %v859_v16 = vmax.f32 %v797_v15, 0.0  ;;  %v1755_v17 = vpop.f32.mrb[22].mxu1  ;;  %2048 = vmatprep.subr.bf16.mxu0 %v2047_v14 }
 0x446   :  { %v812_v18 = vadd.f32 %v1755_v17, %v2495_v46  ;;  %v806_v19 = vpop.f32.mrb[23].mxu1  ;;  %2050 = vmatpush3.bf16.msra.mxu0 %v2047_v14 }
 0x447   :  { %v2051_v20 = vpack.c.bf16 %v860_v36, %v859_v16  ;;  %v807_v21 = vadd.f32 %v2495_v46, %v806_v19 }
 0x448   :  { %v862_v22 = vmax.f32 %v812_v18, 0.0 }
 0x449   :  { %v861_v23 = vmax.f32 %v807_v21, 0.0  ;;  %v1758_v24 = vpop.f32.mrb[24].mxu1  ;;  %2052 = vmatprep.subr.bf16.mxu0 %v2051_v20 }
 0x44a   :  { %v822_v25 = vadd.f32 %v1758_v24, %v2495_v46  ;;  %v816_v26 = vpop.f32.mrb[25].mxu1  ;;  %2054 = vmatpush3.bf16.msra.mxu0 %v2051_v20 }
 0x44b   :  { %v2055_v27 = vpack.c.bf16 %v862_v22, %v861_v23  ;;  %v817_v28 = vadd.f32 %v2495_v46, %v816_v26 }
 0x44c   :  { %v864_v29 = vmax.f32 %v822_v25, 0.0 }
 0x44d   :  { %v863_v30 = vmax.f32 %v817_v28, 0.0  ;;  %v1761_v31 = vpop.f32.mrb[26].mxu1  ;;  %2056 = vmatprep.subr.bf16.mxu0 %v2055_v27 }
 0x44e   :  { %v832_v32 = vadd.f32 %v1761_v31, %v2495_v46  ;;  %v826_v33 = vpop.f32.mrb[27].mxu1  ;;  %2058 = vmatpush3.bf16.msra.mxu0 %v2055_v27 }
 0x44f   :  { %v2059_v34 = vpack.c.bf16 %v864_v29, %v863_v30  ;;  %v827_v35 = vadd.f32 %v2495_v46, %v826_v33 }
 0x450   :  { %v866_v37 = vmax.f32 %v832_v32, 0.0 }
 0x451   :  { %v865_v38 = vmax.f32 %v827_v35, 0.0  ;;  %v1764_v39 = vpop.f32.mrb[28].mxu1  ;;  %2060 = vmatprep.subr.bf16.mxu0 %v2059_v34 }
 0x452   :  { %v842_v40 = vadd.f32 %v1764_v39, %v2495_v46  ;;  %v836_v41 = vpop.f32.mrb[29].mxu1  ;;  %2062 = vmatpush3.bf16.msra.mxu0 %v2059_v34 }
 0x453   :  { %v2063_v42 = vpack.c.bf16 %v866_v37, %v865_v38  ;;  %v837_v43 = vadd.f32 %v2495_v46, %v836_v41 }
 0x454   :  { %v868_v44 = vmax.f32 %v842_v40, 0.0 }
 0x455   :  { %v867_v45 = vmax.f32 %v837_v43, 0.0  ;;  %v1767_v47 = vpop.f32.mrb[30].mxu1  ;;  %2064 = vmatprep.subr.bf16.mxu0 %v2063_v42 }
 0x456   :  { %v852_v48 = vadd.f32 %v1767_v47, %v2495_v46  ;;  %v846_v49 = vpop.f32.mrb[31].mxu1  ;;  %2066 = vmatpush3.bf16.msra.mxu0 %v2063_v42 }
 0x457   :  { %v2067_v50 = vpack.c.bf16 %v868_v44, %v867_v45  ;;  %v847_v51 = vadd.f32 %v2495_v46, %v846_v49 }
 0x458   :  { %v870_v52 = vmax.f32 %v852_v48, 0.0 }
 0x459   :  { %v869_v53 = vmax.f32 %v847_v51, 0.0  ;;  %2068 = vmatprep.subr.bf16.mxu0 %v2067_v50 }
 0x45a   :  { %2070 = vmatpush3.bf16.msra.mxu0 %v2067_v50 }
 0x45b   :  { %v2071_v54 = vpack.c.bf16 %v870_v52, %v869_v53 }
 0x45d   :  { %2072 = vmatprep.subr.bf16.mxu0 %v2071_v54 }
 0x45e   :  { %2074 = vmatpush3.bf16.msra.mxu0 %v2071_v54 }
 0x461   :  { %1801 = vmatmul.mubr.f32.vlgmr.msra.gmra.mrb[32].mxu0 %v2449_v55 }
 0x462   :  { %1803 = vmatprep.mubr.f32.mxu0 %v2451_v56 }
 0x465   :  { %1804 = vmatmul.mubr.f32.gmra.mrb[34].mxu0 %v2455_v57 }
 0x466   :  { %1806 = vmatprep.mubr.f32.mxu0 %v2457_v58 }
 0x469   :  { %1807 = vmatmul.mubr.f32.gmra.mrb[36].mxu0 %v2461_v59 }
 0x46a   :  { %1809 = vmatprep.mubr.f32.mxu0 %v2463_v60 }
 0x46d   :  { %1810 = vmatmul.mubr.f32.gmra.mrb[38].mxu0 %v2467_v61 }
 0x46e   :  { %1812 = vmatprep.mubr.f32.mxu0 %v2469_v62 }
 0x471   :  { %1813 = vmatmul.mubr.f32.gmra.mrb[40].mxu0 %v2473_v63 }
 0x472   :  { %1815 = vmatprep.mubr.f32.mxu0 %v2475_v0 }
 0x475   :  { %1816 = vmatmul.mubr.f32.gmra.mrb[42].mxu0 %v2479_v1 }
 0x476   :  { %1818 = vmatprep.mubr.f32.mxu0 %v2481_v2 }
 0x479   :  { %1819 = vmatmul.mubr.f32.gmra.mrb[44].mxu0 %v2485_v3 }
 0x47a   :  { %1821 = vmatprep.mubr.f32.mxu0 %v2487_v4 }
 0x47d   :  { %1822 = vmatmul.mubr.f32.gmra.mrb[46].mxu0 %v2491_v5 }
 0x47e   :  { %1912 = vmatprep.mubr.f32.mxu0 %v1202_v6 }
 0x534   :  { %v1802_v55 = vpop.f32.mrb[32].mxu0 }
 0x535   :  { %v937_v56 = vpop.f32.mrb[33].mxu0 }
 0x536   :  { %1856 = vmatprep.mubr.f32.mxu1 %v937_v56 }
 0x537   :  { %1857 = vmatmul.mubr.f32.vlgmr.msra.gmra.mrb[32].mxu1 %v1802_v55 }
 0x538   :  { %v1805_v57 = vpop.f32.mrb[34].mxu0 }
 0x539   :  { %v947_v58 = vpop.f32.mrb[35].mxu0 }
 0x53a   :  { %1859 = vmatprep.mubr.f32.mxu1 %v947_v58 }
 0x53b   :  { %1860 = vmatmul.mubr.f32.gmra.mrb[34].mxu1 %v1805_v57 }
 0x53c   :  { %v1808_v59 = vpop.f32.mrb[36].mxu0 }
 0x53d   :  { %v957_v60 = vpop.f32.mrb[37].mxu0 }
 0x53e   :  { %1862 = vmatprep.mubr.f32.mxu1 %v957_v60 }
 0x53f   :  { %1863 = vmatmul.mubr.f32.gmra.mrb[36].mxu1 %v1808_v59 }
 0x540   :  { %v1811_v61 = vpop.f32.mrb[38].mxu0 }
 0x541   :  { %v967_v62 = vpop.f32.mrb[39].mxu0 }
 0x542   :  { %1865 = vmatprep.mubr.f32.mxu1 %v967_v62 }
 0x543   :  { %1866 = vmatmul.mubr.f32.gmra.mrb[38].mxu1 %v1811_v61 }
 0x544   :  { %v1814_v63 = vpop.f32.mrb[40].mxu0 }
 0x545   :  { %v977_v0 = vpop.f32.mrb[41].mxu0 }
 0x546   :  { %1868 = vmatprep.mubr.f32.mxu1 %v977_v0 }
 0x547   :  { %1869 = vmatmul.mubr.f32.gmra.mrb[40].mxu1 %v1814_v63 }
 0x548   :  { %v1817_v1 = vpop.f32.mrb[42].mxu0 }
 0x549   :  { %v987_v2 = vpop.f32.mrb[43].mxu0 }
 0x54a   :  { %1871 = vmatprep.mubr.f32.mxu1 %v987_v2 }
 0x54b   :  { %1872 = vmatmul.mubr.f32.gmra.mrb[42].mxu1 %v1817_v1  ;;  %v1203_v1 = vld [vmem:[%s2572_s5 + $0x8] sm:$0xff] }
 0x54c   :  { %v1820_v3 = vpop.f32.mrb[44].mxu0 }
 0x54d   :  { %v997_v4 = vpop.f32.mrb[45].mxu0 }
 0x54e   :  { %1874 = vmatprep.mubr.f32.mxu1 %v997_v4 }
 0x54f   :  { %1875 = vmatmul.mubr.f32.gmra.mrb[44].mxu1 %v1820_v3 }
 0x550   :  { %v1823_v5 = vpop.f32.mrb[46].mxu0 }
 0x551   :  { %v1007_v46 = vpop.f32.mrb[47].mxu0 }
 0x552   :  { %1877 = vmatprep.mubr.f32.mxu1 %v1007_v46 }
 0x553   :  { %1878 = vmatmul.mubr.f32.gmra.mrb[46].mxu1 %v1823_v5 }
 0x60a   :  { %v1858_v8 = vpop.f32.mrb[32].mxu1 }
 0x60b   :  { %v1113_v9 = vadd.f32 %v1858_v8, %v2531_v7  ;;  %v1107_v10 = vpop.f32.mrb[33].mxu1 }
 0x60c   :  { %v1108_v11 = vadd.f32 %v2531_v7, %v1107_v10 }
 0x60d   :  { %v1187_v12 = vmax.f32 %v1113_v9, 0.0 }
 0x60e   :  { %v1186_v13 = vmax.f32 %v1108_v11, 0.0  ;;  %v1861_v14 = vpop.f32.mrb[34].mxu1 }
 0x60f   :  { %v1123_v15 = vadd.f32 %v1861_v14, %v2531_v7  ;;  %v1117_v36 = vpop.f32.mrb[35].mxu1 }
 0x610   :  { %v2107_v16 = vpack.c.bf16 %v1187_v12, %v1186_v13  ;;  %v1118_v17 = vadd.f32 %v2531_v7, %v1117_v36 }
 0x611   :  { %v1189_v18 = vmax.f32 %v1123_v15, 0.0 }
 0x612   :  { %v1188_v19 = vmax.f32 %v1118_v17, 0.0  ;;  %v1864_v20 = vpop.f32.mrb[36].mxu1  ;;  %2108 = vmatprep.subr.bf16.mxu0 %v2107_v16 }
 0x613   :  { %v1133_v21 = vadd.f32 %v1864_v20, %v2531_v7  ;;  %v1127_v22 = vpop.f32.mrb[37].mxu1  ;;  %2110 = vmatpush3.bf16.msra.mxu0 %v2107_v16 }
 0x614   :  { %v2111_v23 = vpack.c.bf16 %v1189_v18, %v1188_v19  ;;  %v1128_v24 = vadd.f32 %v2531_v7, %v1127_v22 }
 0x615   :  { %v1191_v25 = vmax.f32 %v1133_v21, 0.0 }
 0x616   :  { %v1190_v26 = vmax.f32 %v1128_v24, 0.0  ;;  %v1867_v27 = vpop.f32.mrb[38].mxu1  ;;  %2112 = vmatprep.subr.bf16.mxu0 %v2111_v23 }
 0x617   :  { %v1143_v28 = vadd.f32 %v1867_v27, %v2531_v7  ;;  %v1137_v29 = vpop.f32.mrb[39].mxu1  ;;  %2114 = vmatpush3.bf16.msra.mxu0 %v2111_v23 }
 0x618   :  { %v2115_v30 = vpack.c.bf16 %v1191_v25, %v1190_v26  ;;  %v1138_v31 = vadd.f32 %v2531_v7, %v1137_v29 }
 0x619   :  { %v1193_v32 = vmax.f32 %v1143_v28, 0.0 }
 0x61a   :  { %v1192_v33 = vmax.f32 %v1138_v31, 0.0  ;;  %v1870_v34 = vpop.f32.mrb[40].mxu1  ;;  %2116 = vmatprep.subr.bf16.mxu0 %v2115_v30 }
 0x61b   :  { %v1153_v35 = vadd.f32 %v1870_v34, %v2531_v7  ;;  %v1147_v37 = vpop.f32.mrb[41].mxu1  ;;  %2118 = vmatpush3.bf16.msra.mxu0 %v2115_v30 }
 0x61c   :  { %v2119_v38 = vpack.c.bf16 %v1193_v32, %v1192_v33  ;;  %v1148_v39 = vadd.f32 %v2531_v7, %v1147_v37 }
 0x61d   :  { %v1195_v40 = vmax.f32 %v1153_v35, 0.0 }
 0x61e   :  { %v1194_v41 = vmax.f32 %v1148_v39, 0.0  ;;  %v1873_v42 = vpop.f32.mrb[42].mxu1  ;;  %2120 = vmatprep.subr.bf16.mxu0 %v2119_v38 }
 0x61f   :  { %v1163_v43 = vadd.f32 %v1873_v42, %v2531_v7  ;;  %v1157_v44 = vpop.f32.mrb[43].mxu1  ;;  %2122 = vmatpush3.bf16.msra.mxu0 %v2119_v38 }
 0x620   :  { %v2123_v45 = vpack.c.bf16 %v1195_v40, %v1194_v41  ;;  %v1158_v47 = vadd.f32 %v2531_v7, %v1157_v44 }
 0x621   :  { %v1197_v48 = vmax.f32 %v1163_v43, 0.0 }
 0x622   :  { %v1196_v49 = vmax.f32 %v1158_v47, 0.0  ;;  %v1876_v50 = vpop.f32.mrb[44].mxu1  ;;  %2124 = vmatprep.subr.bf16.mxu0 %v2123_v45 }
 0x623   :  { %v1173_v51 = vadd.f32 %v1876_v50, %v2531_v7  ;;  %v1167_v52 = vpop.f32.mrb[45].mxu1  ;;  %2126 = vmatpush3.bf16.msra.mxu0 %v2123_v45 }
 0x624   :  { %v2127_v53 = vpack.c.bf16 %v1197_v48, %v1196_v49  ;;  %v1168_v54 = vadd.f32 %v2531_v7, %v1167_v52 }
 0x625   :  { %v1199_v55 = vmax.f32 %v1173_v51, 0.0 }
 0x626   :  { %v1198_v56 = vmax.f32 %v1168_v54, 0.0  ;;  %v1879_v57 = vpop.f32.mrb[46].mxu1  ;;  %2128 = vmatprep.subr.bf16.mxu0 %v2127_v53 }
 0x627   :  { %v1183_v58 = vadd.f32 %v1879_v57, %v2531_v7  ;;  %v1177_v59 = vpop.f32.mrb[47].mxu1  ;;  %2130 = vmatpush3.bf16.msra.mxu0 %v2127_v53 }
 0x628   :  { %v2131_v60 = vpack.c.bf16 %v1199_v55, %v1198_v56  ;;  %v1178_v61 = vadd.f32 %v2531_v7, %v1177_v59 }
 0x629   :  { %v1201_v62 = vmax.f32 %v1183_v58, 0.0 }
 0x62a   :  { %v1200_v63 = vmax.f32 %v1178_v61, 0.0  ;;  %2132 = vmatprep.subr.bf16.mxu0 %v2131_v60 }
 0x62b   :  { %2134 = vmatpush3.bf16.msra.mxu0 %v2131_v60 }
 0x62c   :  { %v2135_v0 = vpack.c.bf16 %v1201_v62, %v1200_v63 }
 0x62e   :  { %2136 = vmatprep.subr.bf16.mxu0 %v2135_v0 }
 0x62f   :  { %2138 = vmatpush3.bf16.msra.mxu0 %v2135_v0 }
 0x632   :  { %1913 = vmatmul.mubr.f32.vlgmr.msra.gmra.mrb[48].mxu0 %v1203_v1 }
 0x705   :  { %v1914_v2 = vpop.f32.mrb[48].mxu0 }
 0x706   :  { %1280 = vst [vmem:[#allocation8 + $0x8] sm:$0xff] %v1914_v2  ;;  %v1270_v3 = vpop.f32.mrb[49].mxu0 }
 0x707   :  { %1279 = vst [vmem:[#allocation8] sm:$0xff] %v1270_v3 }
 0x708   :  { %2228 = shalt.err (!%p2225_p0)
}
 0x709   :  { %s2229_s9 = scalar_lea.hbm %s2573_s6, 256 }
 0x70a   :  { %p2230_p1 = scmp.ne.s32.totalorder %s2573_s6, %s2229_s9  ;;  %p2233_p2 = scmp.lt.u32.totalorder %s2229_s9, %s2573_s6 }
 0x70c   :  { %p2235_p3 = pnand %p2233_p2, %p2230_p1 }
 0x70e   :  { %2238 = shalt.err (!%p2235_p3)
}
 0x70f   :  { %1292 = dma.vmem_to_hbm [thread:$0]  %s1287_s29, 256, %s2573_s6, [#allocation4], %s2249_s3, %s2249_s3, %s2250_s22  }
 0x710   :  { %2243 = dma.done.wait [#allocation4], 256  }
 0x711   :  { %2244 = vsyncadd [#allocation4], 4294967040 }
 0x712   :  { %1296 = vsyncpa [#allocation3], 1 }
 0x713   :  { %1297 = vsyncpa [#allocation6], 1 }
 0x714   :  { %1298 = vsyncpa [#allocation4], 1 }

</bundles_post_ra>
